<compile_context>
chip_gen: v6e
topology: v6e:2x2x1
jax: 0.10.0
libtpu: 0.0.40
codegen_flags: <defaults>
</compile_context>

<pallas_src>
import functools

import jax
import jax.numpy as jnp
from jax.experimental import pallas as pl
from jax.experimental.pallas import tpu as pltpu


# ----------------------------------------------------------------------------
# Kernels
# ----------------------------------------------------------------------------
def _reinforce_kernel(probs_ref, reward_ref, action_ref, out_ref):
    """Single-block-over-A path: the whole action axis fits in one VMEM block."""
    probs = probs_ref[...].astype(jnp.float32)      # (tb, A)  upcast after DMA
    reward = reward_ref[...]                        # (tb, 1) f32
    action = action_ref[...]                        # (tb, 1) i32

    # Vectorized gather of probs[b, action[b]]: lane-axis iota + mask.
    lane = jax.lax.broadcasted_iota(jnp.int32, probs.shape, dimension=1)
    mask = lane == action                                                  # (tb, A)
    selected = jnp.sum(jnp.where(mask, probs, 0.0), axis=-1, keepdims=True)  # (tb, 1)

    # Categorical normalizes un-normalized probs along the action axis.
    total = jnp.sum(probs, axis=-1, keepdims=True)                         # (tb, 1)

    # One log of the ratio (single EUP push per row); exact divide keeps 1e-5.
    out_ref[...] = (-jnp.log(selected / total)) * reward


def _reinforce_split_kernel(probs_ref, reward_ref, action_ref, out_ref,
                            sel_acc, tot_acc, *, num_actions, block_a):
    """Large-A path: innermost 'arbitrary' grid axis over A with accumulators."""
    k = pl.program_id(1)

    @pl.when(k == 0)
    def _():
        sel_acc[...] = jnp.zeros_like(sel_acc)
        tot_acc[...] = jnp.zeros_like(tot_acc)

    probs = probs_ref[...].astype(jnp.float32)      # (tb, ta)
    action = action_ref[...]                        # (tb, 1) i32

    lane = jax.lax.broadcasted_iota(jnp.int32, probs.shape, dimension=1) + k * block_a
    valid = lane < num_actions                      # mask ragged last A-block
    sel_acc[...] += jnp.sum(jnp.where(lane == action, probs, 0.0),
                            axis=-1, keepdims=True)
    tot_acc[...] += jnp.sum(jnp.where(valid, probs, 0.0),
                            axis=-1, keepdims=True)

    @pl.when(k == pl.num_programs(1) - 1)
    def _():
        out_ref[...] = (-jnp.log(sel_acc[...] / tot_acc[...])) * reward_ref[...]


# ----------------------------------------------------------------------------
# Tile / VMEM sizing
# ----------------------------------------------------------------------------
def _round_up(x, m):
    return (x + m - 1) // m * m


def _vmem_budget():
    """Generation-aware VMEM limit + per-kernel tile budget."""
    try:
        cap = pltpu.get_tpu_info().vmem_capacity_bytes
    except Exception:  # pragma: no cover - conservative fallback
        cap = 64 * 1024 * 1024
    vmem_limit = min(cap // 2, 64 * 1024 * 1024)   # 64 MiB v5e/v6e, 32 MiB v7x
    tile_budget = vmem_limit // 2                  # headroom for compiler scratch
    return vmem_limit, tile_budget


def _sublane_multiple(itemsize):
    # f32 -> 8, bf16 -> 16, int8/fp8 -> 32 sublane packing.
    return 8 * max(1, 4 // max(itemsize, 1))


def _pick_batch_tile(batch, num_actions, itemsize, budget):
    """Largest batch tile whose DMA double-buffers fit the budget."""
    # Only the real double-buffers count: probs block (2*tb*A*itemsize) plus
    # the tiny (tb, 1) reward/action/out rows (double-buffered 32-bit).
    per_row = 2 * num_actions * itemsize + 6 * 4
    tb = (budget // max(per_row, 1)) // 128 * 128
    tb = max(128, min(tb, 65536))
    tb = min(tb, _round_up(batch, 128))
    # Keep >= 2 grid steps when B allows, so both v7x TensorCores get work
    # (grid overhead ~0.35us/step is negligible at these block sizes).
    if batch >= 256:
        tb = min(tb, _round_up(pl.cdiv(batch, 2), 128))
    tb = max(tb, 128)
    if batch < 128:
        tb = _round_up(batch, _sublane_multiple(itemsize))
    return tb


def _pick_split_tiles(batch, num_actions, itemsize, budget, ta=None):
    """Tiles for the large-A path (grid over both B and A)."""
    if ta is None:
        ta = min(_round_up(num_actions, 128), 2048)
    per_row = 2 * ta * itemsize + 10 * 4
    tb = (budget // max(per_row, 1)) // 128 * 128
    tb = max(128, min(tb, 8192, _round_up(batch, 128)))
    if batch >= 256:
        tb = min(tb, _round_up(pl.cdiv(batch, 2), 128))
    if batch < 128:
        tb = _round_up(batch, _sublane_multiple(itemsize))
    return tb, ta


# ----------------------------------------------------------------------------
# Wrapper
# ----------------------------------------------------------------------------
def reinforce_loss(probs, reward, action_idx, *, block_b=None, block_a=None):
    """probs: (B, A) float, reward: (B,) float, action_idx: (B,) int -> (B,) f32."""
    B, A = probs.shape
    itemsize = jnp.dtype(probs.dtype).itemsize
    # probs stays in the caller's dtype; only the tiny per-row operands are cast.
    reward_col = reward.astype(jnp.float32).reshape(B, 1)
    action_col = action_idx.astype(jnp.int32).reshape(B, 1)

    vmem_limit, tile_budget = _vmem_budget()

    cost = pl.CostEstimate(
        flops=int(4 * B * A + 6 * B),
        transcendentals=int(B),
        bytes_accessed=int(itemsize * B * A + 12 * B),
    )
    compiler_params = pltpu.CompilerParams(
        dimension_semantics=("parallel",),
        vmem_limit_bytes=vmem_limit,
    )

    # Split the action axis only when even a tb=128 block would blow the budget
    # (vocab-scale A), or when explicitly requested.
    split_a = (block_a is not None) or (2 * 128 * A * itemsize > tile_budget)

    if not split_a:
        tb = block_b or _pick_batch_tile(B, A, itemsize, tile_budget)
        grid = (pl.cdiv(B, tb),)
        out = pl.pallas_call(
            _reinforce_kernel,
            out_shape=jax.ShapeDtypeStruct((B, 1), jnp.float32),
            grid=grid,
            in_specs=[
                pl.BlockSpec((tb, A), lambda i: (i, 0)),   # probs, native layout
                pl.BlockSpec((tb, 1), lambda i: (i, 0)),   # reward column
                pl.BlockSpec((tb, 1), lambda i: (i, 0)),   # action column
            ],
            out_specs=pl.BlockSpec((tb, 1), lambda i: (i, 0)),
            compiler_params=compiler_params,
            cost_estimate=cost,
        )(probs, reward_col, action_col)
    else:
        tb, ta = _pick_split_tiles(B, A, itemsize, tile_budget, ta=block_a)
        if block_b is not None:
            tb = block_b
        grid = (pl.cdiv(B, tb), pl.cdiv(A, ta))
        kernel = functools.partial(
            _reinforce_split_kernel, num_actions=A, block_a=ta)
        out = pl.pallas_call(
            kernel,
            out_shape=jax.ShapeDtypeStruct((B, 1), jnp.float32),
            grid=grid,
            in_specs=[
                pl.BlockSpec((tb, ta), lambda i, k: (i, k)),
                pl.BlockSpec((tb, 1), lambda i, k: (i, 0)),
                pl.BlockSpec((tb, 1), lambda i, k: (i, 0)),
            ],
            out_specs=pl.BlockSpec((tb, 1), lambda i, k: (i, 0)),
            scratch_shapes=[
                pltpu.VMEM((tb, 1), jnp.float32),   # selected accumulator
                pltpu.VMEM((tb, 1), jnp.float32),   # total accumulator
            ],
            compiler_params=pltpu.CompilerParams(
                dimension_semantics=("parallel", "arbitrary"),
                vmem_limit_bytes=vmem_limit,
            ),
            cost_estimate=cost,
        )(probs, reward_col, action_col)

    return out.reshape(B)


# ----------------------------------------------------------------------------
# Reference + self-test
# ----------------------------------------------------------------------------
def _reference(probs, reward, action_idx):
    # Pure-JAX reference of Categorical(probs).log_prob(a) * -reward
    p = probs.astype(jnp.float32)
    p = p / jnp.sum(p, axis=-1, keepdims=True)
    logp = jnp.log(p[jnp.arange(probs.shape[0]), action_idx])
    return -logp * reward.astype(jnp.float32)


if __name__ == "__main__":
    key = jax.random.PRNGKey(0)
    k1, k2, k3 = jax.random.split(key, 3)

    # 1) Small shape consistent with the module: batch of 8 states, 16 actions.
    B, A = 8, 16
    probs = jax.random.uniform(k1, (B, A), jnp.float32, minval=0.1, maxval=1.0)
    reward = jax.random.normal(k2, (B,), jnp.float32)
    action = jax.random.randint(k3, (B,), 0, A, dtype=jnp.int32)
    loss = jax.block_until_ready(reinforce_loss(probs, reward, action))
    ref = _reference(probs, reward, action)
    assert loss.shape == (B,)
    assert jnp.allclose(loss, ref, atol=1e-5, rtol=1e-5), (loss, ref)

    # 2) Multi-tile grid + ragged tail block (no host-side padding of probs).
    B2, A2 = 300, 33
    k4, k5, k6 = jax.random.split(k1, 3)
    probs2 = jax.random.uniform(k4, (B2, A2), jnp.float32, minval=0.05, maxval=1.0)
    reward2 = jax.random.normal(k5, (B2,), jnp.float32)
    action2 = jax.random.randint(k6, (B2,), 0, A2, dtype=jnp.int32)
    loss2 = jax.block_until_ready(reinforce_loss(probs2, reward2, action2))
    assert loss2.shape == (B2,)
    assert jnp.allclose(loss2, _reference(probs2, reward2, action2),
                        atol=1e-5, rtol=1e-5)

    # 3) Large-A path (forced) with a ragged last A-block: accumulators + pl.when.
    B3, A3 = 64, 200
    k7, k8, k9 = jax.random.split(k2, 3)
    probs3 = jax.random.uniform(k7, (B3, A3), jnp.float32, minval=0.05, maxval=1.0)
    reward3 = jax.random.normal(k8, (B3,), jnp.float32)
    action3 = jax.random.randint(k9, (B3,), 0, A3, dtype=jnp.int32)
    loss3 = jax.block_until_ready(
        reinforce_loss(probs3, reward3, action3, block_a=128))
    assert loss3.shape == (B3,)
    assert jnp.allclose(loss3, _reference(probs3, reward3, action3),
                        atol=1e-5, rtol=1e-5)

    # 4) bf16 probs streamed in native dtype, upcast inside the kernel.
    B4, A4 = 48, 64
    k10, k11, k12 = jax.random.split(k3, 3)
    probs4 = jax.random.uniform(k10, (B4, A4), jnp.float32,
                                minval=0.05, maxval=1.0).astype(jnp.bfloat16)
    reward4 = jax.random.normal(k11, (B4,), jnp.float32)
    action4 = jax.random.randint(k12, (B4,), 0, A4, dtype=jnp.int32)
    loss4 = jax.block_until_ready(reinforce_loss(probs4, reward4, action4))
    assert loss4.shape == (B4,)
    assert jnp.allclose(loss4, _reference(probs4, reward4, action4),
                        atol=1e-4, rtol=1e-4)

    print("KERNEL_OK")
</pallas_src>

<mosaic_0001>
module attributes {stable_mosaic.version = 11 : i64} {
  func.func @_reinforce_kernel(%arg0: i32, %arg1: memref<8x16xf32, #tpu.memory_space<vmem>>, %arg2: memref<8x1xf32, #tpu.memory_space<vmem>>, %arg3: memref<8x1xi32, #tpu.memory_space<vmem>>, %arg4: memref<8x1xf32, #tpu.memory_space<vmem>>) attributes {dimension_semantics = [#tpu.dimension_semantics<parallel>], iteration_bounds = array<i64: 1>, scalar_prefetch = 0 : i64, scratch_operands = 0 : i64, tpu.core_type = #tpu.core_type<tc>, window_params = [{transform_indices = @transform_0, window_bounds = array<i64: 8, 16>}, {transform_indices = @transform_1, window_bounds = array<i64: 8, 1>}, {transform_indices = @transform_2, window_bounds = array<i64: 8, 1>}, {transform_indices = @transform_3, window_bounds = array<i64: 8, 1>}]} {
    %c0 = arith.constant 0 : index
    %c0_0 = arith.constant 0 : index
    %0 = vector.load %arg1[%c0, %c0_0] : memref<8x16xf32, #tpu.memory_space<vmem>>, vector<8x16xf32>
    %c0_1 = arith.constant 0 : index
    %c0_2 = arith.constant 0 : index
    %1 = vector.load %arg2[%c0_1, %c0_2] : memref<8x1xf32, #tpu.memory_space<vmem>>, vector<8x1xf32>
    %c0_3 = arith.constant 0 : index
    %c0_4 = arith.constant 0 : index
    %2 = vector.load %arg3[%c0_3, %c0_4] : memref<8x1xi32, #tpu.memory_space<vmem>>, vector<8x1xi32>
    %3 = tpu.iota {dimensions = array<i32: 1>} : vector<8x16xi32>
    %4 = vector.broadcast %2 : vector<8x1xi32> to vector<8x16xi32>
    %5 = arith.cmpi eq, %3, %4 : vector<8x16xi32>
    %cst = arith.constant 0.000000e+00 : f32
    %6 = vector.broadcast %cst : f32 to vector<8x16xf32>
    %7 = arith.select %5, %0, %6 : vector<8x16xi1>, vector<8x16xf32>
    %cst_5 = arith.constant dense<0.000000e+00> : vector<8xf32>
    %8 = vector.multi_reduction <add>, %7, %cst_5 [1] : vector<8x16xf32> to vector<8xf32>
    %9 = vector.shape_cast %8 : vector<8xf32> to vector<8x1xf32>
    %cst_6 = arith.constant dense<0.000000e+00> : vector<8xf32>
    %10 = vector.multi_reduction <add>, %0, %cst_6 [1] : vector<8x16xf32> to vector<8xf32>
    %11 = vector.shape_cast %10 : vector<8xf32> to vector<8x1xf32>
    %12 = arith.divf %9, %11 : vector<8x1xf32>
    %13 = math.log %12 : vector<8x1xf32>
    %cst_7 = arith.constant 0.000000e+00 : f32
    %14 = vector.broadcast %cst_7 : f32 to vector<8x1xf32>
    %15 = arith.subf %14, %13 : vector<8x1xf32>
    %16 = arith.mulf %15, %1 : vector<8x1xf32>
    %c0_8 = arith.constant 0 : index
    %c0_9 = arith.constant 0 : index
    %17 = vector.load %arg4[%c0_8, %c0_9] : memref<8x1xf32, #tpu.memory_space<vmem>>, vector<8x1xf32>
    tpu.vector_store %arg4[%c0_8, %c0_9], %16 {strides = array<i32>} : memref<8x1xf32, #tpu.memory_space<vmem>>, vector<8x1xf32>,
    return
  }
  func.func @transform_0(%arg0: i32) -> (i32, i32) {
    %c0_i32 = arith.constant 0 : i32
    %c0_i32_0 = arith.constant 0 : i32
    return %arg0, %c0_i32 : i32, i32
  }
  func.func @transform_1(%arg0: i32) -> (i32, i32) {
    %c0_i32 = arith.constant 0 : i32
    %c0_i32_0 = arith.constant 0 : i32
    return %arg0, %c0_i32 : i32, i32
  }
  func.func @transform_2(%arg0: i32) -> (i32, i32) {
    %c0_i32 = arith.constant 0 : i32
    %c0_i32_0 = arith.constant 0 : i32
    return %arg0, %c0_i32 : i32, i32
  }
  func.func @transform_3(%arg0: i32) -> (i32, i32) {
    %c0_i32 = arith.constant 0 : i32
    %c0_i32_0 = arith.constant 0 : i32
    return %arg0, %c0_i32 : i32, i32
  }
}

</mosaic_0001>

<bundles_post_ra>
// kernel: tpu_custom_call.1
= control target key start
LH: loop header
LB: loop body
LE: loop exit
PB: predicated region body
PF: predicated region fallthrough
CT: control target
= control target key end

     0   :  { %v49_v0 = vmov 0   ;;  %vm24_vm0 = vcmask 130048   ;;  %v17_v4 = vlaneseq  ;;  %vm37_vm2 = vcmask 7168   ;;  %s82_s2 = inlined_call_operand.vmem [shape: s32[8,1], index: 2, kind: input, shape index: {}]   ;;  %s83_s0 = inlined_call_operand.vmem [shape: f32[8,16], index: 0, kind: input, shape index: {}]   ;;  %s84_s1 = inlined_call_operand.vmem [shape: f32[8,1], index: 1, kind: input, shape index: {}]   ;;  %s85_s3 = inlined_call_operand.vmem [shape: f32[8,1], index: 3, kind: output, shape index: {}]  }
   0x1   :  { %44 = vset.pattern.permute.xlu0 %v49_v0  ;;  %v16_v1 = vld [vmem:[%s82_s2] sm:$0xff] }
   0x2   :  { %20 = vperm.xlu0 %44, %v16_v1   ;;  %v14_v2 = vld [vmem:[%s83_s0] sm:$0xff]  ;;  %v18_v5 = vand.u32 127, %v17_v4 }
   0x3   :  { %v28_v3 = vsel %vm24_vm0, %v14_v2, 0.0  ;;  %v15_v15 = vld [vmem:[%s84_s1] sm:$0xff] }
  0x21   :  { %29 = vadd.xlane.f32.xlu0 %v28_v3 }
  0x7d   :  { %v21_v6 = vpop.permute.xlu0 %20 }
  0x7e   :  { %vm22_vm1 = vcmp.eq.s32.totalorder %v18_v5, %v21_v6 }
  0x7f   :  { %v23_v7 = vsel %vm22_vm1, %v14_v2, 0.0 }
  0x80   :  { %v25_v8 = vsel %vm24_vm0, %v23_v7, 0.0 }
  0x81   :  { %26 = vadd.xlane.f32.xlu1 %v25_v8 }
  0xaa   :  { %v30_v9 = vpop.xlane.xlu0 %29 }
  0xab   :  { %45 = vrcp.f32 %v30_v9 }
  0xb8   :  { %v46_v10 = vpop.eup %45 }
 0x10a   :  { %v27_v11 = vpop.xlane.xlu1 %26 }
 0x10b   :  { %v32_v12 = vmul.f32 %v46_v10, %v27_v11 }
 0x10d   :  { %47 = vlog2.f32 %v32_v12 }
 0x11a   :  { %v48_v13 = vpop.eup %47 }
 0x11b   :  { %v34_v14 = vmul.f32 0.6931472, %v48_v13 }
 0x11d   :  { %v35_v16 = vsub.f32 0.0, %v34_v14 }
 0x11f   :  { %v36_v17 = vmul.f32 %v35_v16, %v15_v15 }
 0x121   :  { %38 = vst.msk [vmem:[%s85_s3] sm:$0xff] %vm37_vm2, %v36_v17 }

</bundles_post_ra>
